<compile_context>
chip_gen: v5e
topology: v5e:2x2
jax: 0.10.0
libtpu: 0.0.40
codegen_flags: <defaults>
</compile_context>

<pallas_src>
import jax
import jax.numpy as jnp
from jax.experimental import pallas as pl
from jax.experimental.pallas import tpu as pltpu


def _round_up(x, m):
    return ((x + m - 1) // m) * m


def _matmul_bias_kernel(x_ref, w_ref, b_ref, o_ref):
    """One-shot (tm, K) x (K, tn) MXU matmul with fused f32 bias add."""
    acc = jnp.dot(x_ref[...], w_ref[...], preferred_element_type=jnp.float32)
    o_ref[...] = (acc + b_ref[...]).astype(o_ref.dtype)


def _choose_tm(m, sublane):
    # Big tiles for an HBM-bound stream, but keep >= 2 grid steps on the
    # parallel M axis when M allows it (v7x shards parallel axes over 2 TCs).
    for cand in (512, 256, 128, 64, 32, 16, 8):
        if cand % sublane:
            continue
        if m >= 2 * cand:
            return cand
    return _round_up(max(m, 1), sublane)


def _patch_conv_pallas(x, weight, bias, stride, *, stream_dtype=jnp.bfloat16):
    """Conv2d(kernel=stride, stride=stride) == patchify + matmul (Pallas)."""
    N, C, H, W = x.shape
    out_f = weight.shape[0]
    s = stride
    assert H % s == 0 and W % s == 0, "spatial dims must be divisible by stride"
    Ho, Wo = H // s, W // s
    out_dtype = x.dtype

    # im2col for kernel==stride: reshape/transpose glue in plain JAX.
    # TODO(synk): fuse the patchify into the kernel to save an HBM round trip.
    patches = (
        x.reshape(N, C, Ho, s, Wo, s)
        .transpose(0, 2, 4, 1, 3, 5)
        .reshape(N * Ho * Wo, C * s * s)
    )
    # PyTorch conv weight is (out, in, kH, kW); flatten to (K, out) matching
    # the (C, kH, kW) patch ordering above.
    wmat = weight.reshape(out_f, C * s * s).T
    M, K = patches.shape

    # bf16 streaming halves HBM bytes on this memory-bound kernel.
    patches = patches.astype(stream_dtype)
    wmat = wmat.astype(stream_dtype)
    bvec = bias.astype(jnp.float32)

    # Lane-dense output: pad out_features to a multiple of 128 with zero
    # weight/bias columns so every output block store is unmasked.
    Np = _round_up(max(out_f, 128), 128)
    if Np != out_f:
        wmat = jnp.pad(wmat, ((0, 0), (0, Np - out_f)))
        bvec = jnp.pad(bvec, (0, Np - out_f))
    bmat = bvec.reshape(1, Np)

    sublane = 16 if jnp.dtype(stream_dtype) == jnp.dtype(jnp.bfloat16) else 8
    tm = _choose_tm(M, sublane)
    Mp = pl.cdiv(M, tm) * tm
    if Mp != M:
        patches = jnp.pad(patches, ((0, Mp - M), (0, 0)))
    # 256-wide N tiles match the v6e/v7x MXU; 128 otherwise (fine on v5e).
    tn = 256 if Np % 256 == 0 else 128

    # VMEM footprint (double-buffered) is tiny here (K is small); the default
    # scoped VMEM limit is ample on v5e/v6e/v7x, so no explicit override.
    out = pl.pallas_call(
        _matmul_bias_kernel,
        out_shape=jax.ShapeDtypeStruct((Mp, Np), out_dtype),
        grid_spec=pltpu.PrefetchScalarGridSpec(
            num_scalar_prefetch=0,
            grid=(Mp // tm, Np // tn),
            in_specs=[
                pl.BlockSpec((tm, K), lambda i, j: (i, 0)),
                pl.BlockSpec((K, tn), lambda i, j: (0, j)),
                pl.BlockSpec((1, tn), lambda i, j: (0, j)),
            ],
            out_specs=pl.BlockSpec((tm, tn), lambda i, j: (i, j)),
        ),
        compiler_params=pltpu.CompilerParams(
            # No reduction axis left -> both grid axes are parallel (megacore).
            dimension_semantics=("parallel", "parallel"),
        ),
    )(patches, wmat, bmat)

    # Drop M/N padding; back to NCHW (XLA fuses slice + reshape + transpose).
    # TODO(synk): return NHWC directly if the consumer tolerates it.
    out = out[:M, :out_f]
    return out.reshape(N, Ho, Wo, out_f).transpose(0, 3, 1, 2)


class BaseNetwork:
    """JAX port of butterflydetector BaseNetwork: thin wrapper over `net`."""

    def __init__(self, net, shortname, input_output_scale, out_features):
        self.net = net
        self.shortname = shortname
        self.input_output_scale = input_output_scale
        self.out_features = out_features

    def forward(self, *args):
        return self.net(*args)

    __call__ = forward


if __name__ == "__main__":
    # Small synthetic config: stride (input_output_scale) 4, 32 output features.
    in_channels = 4
    input_output_scale = 4
    out_features = 32

    key = jax.random.PRNGKey(0)
    kx, kw, kb = jax.random.split(key, 3)

    x = jax.random.normal(kx, (2, in_channels, 16, 16), dtype=jnp.float32)
    # Deterministic synthetic parameters (shapes as a PyTorch Conv2d would have).
    weight = (
        jax.random.normal(
            kw,
            (out_features, in_channels, input_output_scale, input_output_scale),
            dtype=jnp.float32,
        )
        * 0.05
    )
    bias = jax.random.normal(kb, (out_features,), dtype=jnp.float32) * 0.01

    net = lambda inp: _patch_conv_pallas(inp, weight, bias, input_output_scale)
    model = BaseNetwork(net, "patchembed", input_output_scale, out_features)

    y = jax.block_until_ready(model(x))

    Ho = Wo = 16 // input_output_scale
    assert y.shape == (2, out_features, Ho, Wo)
    assert y.dtype == jnp.float32

    # Reference 1: same precision regime (bf16 inputs, f32 accumulation).
    ref_bf16 = jax.lax.conv_general_dilated(
        x.astype(jnp.bfloat16),
        weight.astype(jnp.bfloat16),
        window_strides=(input_output_scale, input_output_scale),
        padding="VALID",
        dimension_numbers=("NCHW", "OIHW", "NCHW"),
        preferred_element_type=jnp.float32,
    ) + bias.reshape(1, -1, 1, 1)
    assert jnp.allclose(y, ref_bf16, atol=1e-2, rtol=1e-2)

    # Reference 2: full-f32 conv semantics (loose tolerance for bf16 streaming).
    ref_f32 = jax.lax.conv_general_dilated(
        x,
        weight,
        window_strides=(input_output_scale, input_output_scale),
        padding="VALID",
        dimension_numbers=("NCHW", "OIHW", "NCHW"),
    ) + bias.reshape(1, -1, 1, 1)
    assert jnp.allclose(y, ref_f32, atol=5e-2, rtol=5e-2)

    print("KERNEL_OK")
</pallas_src>

<mosaic_0001>
module attributes {stable_mosaic.version = 11 : i64} {
  func.func @_matmul_bias_kernel(%arg0: i32, %arg1: i32, %arg2: memref<16x64xbf16, #tpu.memory_space<vmem>>, %arg3: memref<64x128xbf16, #tpu.memory_space<vmem>>, %arg4: memref<1x128xf32, #tpu.memory_space<vmem>>, %arg5: memref<16x128xf32, #tpu.memory_space<vmem>>) attributes {dimension_semantics = [#tpu.dimension_semantics<parallel>, #tpu.dimension_semantics<parallel>], iteration_bounds = array<i64: 2, 1>, scalar_prefetch = 0 : i64, scratch_operands = 0 : i64, tpu.core_type = #tpu.core_type<tc>, window_params = [{transform_indices = @transform_0, window_bounds = array<i64: 16, 64>}, {transform_indices = @transform_1, window_bounds = array<i64: 64, 128>}, {transform_indices = @transform_2, window_bounds = array<i64: 1, 128>}, {transform_indices = @transform_3, window_bounds = array<i64: 16, 128>}]} {
    %c0 = arith.constant 0 : index
    %c0_0 = arith.constant 0 : index
    %0 = vector.load %arg2[%c0, %c0_0] : memref<16x64xbf16, #tpu.memory_space<vmem>>, vector<16x64xbf16>
    %c0_1 = arith.constant 0 : index
    %c0_2 = arith.constant 0 : index
    %1 = vector.load %arg3[%c0_1, %c0_2] : memref<64x128xbf16, #tpu.memory_space<vmem>>, vector<64x128xbf16>
    %cst = arith.constant dense<0.000000e+00> : vector<16x128xf32>
    %2 = tpu.matmul %0, %1, %cst {dimension_numbers = #tpu.dot_dimension_numbers<[1], [0], [0], [1], [0, 0, 1, 1], [], []>} : vector<16x64xbf16>, vector<64x128xbf16>, vector<16x128xf32> -> vector<16x128xf32>
    %c0_3 = arith.constant 0 : index
    %c0_4 = arith.constant 0 : index
    %3 = vector.load %arg4[%c0_3, %c0_4] : memref<1x128xf32, #tpu.memory_space<vmem>>, vector<1x128xf32>
    %4 = vector.broadcast %3 : vector<1x128xf32> to vector<16x128xf32>
    %5 = arith.addf %2, %4 : vector<16x128xf32>
    %c0_5 = arith.constant 0 : index
    %c0_6 = arith.constant 0 : index
    %6 = vector.load %arg5[%c0_5, %c0_6] : memref<16x128xf32, #tpu.memory_space<vmem>>, vector<16x128xf32>
    tpu.vector_store %arg5[%c0_5, %c0_6], %5 {strides = array<i32>} : memref<16x128xf32, #tpu.memory_space<vmem>>, vector<16x128xf32>,
    return
  }
  func.func @transform_0(%arg0: i32, %arg1: i32) -> (i32, i32) {
    %c0_i32 = arith.constant 0 : i32
    %c0_i32_0 = arith.constant 0 : i32
    return %arg0, %c0_i32 : i32, i32
  }
  func.func @transform_1(%arg0: i32, %arg1: i32) -> (i32, i32) {
    %c0_i32 = arith.constant 0 : i32
    %c0_i32_0 = arith.constant 0 : i32
    return %c0_i32, %arg1 : i32, i32
  }
  func.func @transform_2(%arg0: i32, %arg1: i32) -> (i32, i32) {
    %c0_i32 = arith.constant 0 : i32
    %c0_i32_0 = arith.constant 0 : i32
    return %c0_i32, %arg1 : i32, i32
  }
  func.func @transform_3(%arg0: i32, %arg1: i32) -> (i32, i32) {
    %c0_i32 = arith.constant 0 : i32
    return %arg0, %arg1 : i32, i32
  }
}

</mosaic_0001>

<bundles_post_ra>
// kernel: tpu_custom_call.1
= control target key start
LH: loop header
LB: loop body
LE: loop exit
PB: predicated region body
PF: predicated region fallthrough
CT: control target
= control target key end

     0   :  { %s889_s0 = inlined_call_operand.hbm [shape: bf16[32,64], index: 0, kind: input, shape index: {}]   ;;  %s890_s1 = inlined_call_operand.hbm [shape: bf16[64,128], index: 1, kind: input, shape index: {}]   ;;  %s891_s2 = inlined_call_operand.vmem [shape: f32[1,128], index: 2, kind: input, shape index: {}]   ;;  %s892_s3 = inlined_call_operand.hbm [shape: f32[32,128], index: 3, kind: output, shape index: {}]  }
   0x1   :  { %894 = sst [smem:[#allocation11_spill]] %s890_s1 }
   0x2   :  { %8 = vsyncpa [#allocation3], 0 }
   0x3   :  { %10 = vsyncpa [#allocation3 + $0x1], 0 }
   0x4   :  { %11 = vsyncpa [#allocation6], 0 }
   0x5   :  { %12 = vsyncpa [#allocation4], 0 }
   0x6   :  { %14 = vsyncpa [#allocation4 + $0x1], 0  ;;  %s730_s12 = smov 0   ;;  %s732_s13 = smov 0  }
   0x7   :  { %s734_s14 = smov 0   ;;  %s736_s15 = smov 0  }
   0x8   :  { %s738_s16 = smov 0   ;;  %s740_s17 = smov 0  }
   0x9 LB: > { %s433_s18 = sadd.s32 4294967295, %s703_s17   ;;  %s434_s19 = sadd.s32 4294967294, %s703_s17   ;;  %s703_s17 = sphi %s740_s17, %s20_s17   ;;  %s699_s16 = sphi %s738_s16, %s908_s16   ;;  %s695_s15 = sphi %s736_s15, %s907_s15   ;;  %s691_s14 = sphi %s734_s14, %s906_s14   ;;  %s687_s13 = sphi %s732_s13, %s905_s13   ;;  %s683_s12 = sphi %s730_s12, %s904_s12  }
   0xa   : > { %p52_p0 = scmp.ne.s32.totalorder %s687_s13, %s683_s12  ;;  %p764_p1 = scmp.eq.s32.totalorder %s433_s18, 0 }
   0xb   : > { %p768_p2 = scmp.eq.s32.totalorder %s433_s18, 1  ;;  %p136_p3 = scmp.eq.s32.totalorder %s434_s19, 1 }
   0xc   : > { %p774_p4 = por %p764_p1, %p52_p0  ;;  %p435_p5 = scmp.ge.s32.totalorder %s703_s17, 1 }
   0xd   : > { %p779_p6 = por %p136_p3, %p52_p0  ;;  %p143_p7 = scmp.lt.s32.totalorder %s703_s17, 3 }
   0xe   : > { %s899_s1 = sld [smem:[#allocation11_spill]]  ;;  %s705_s28 = smov [#allocation5]  }
   0xf   : > { %p787_p8 = pnand %p435_p5, %p143_p7  ;;  %s158_s29 = sshll.u32 %s705_s28, 4  ;;  %s159_s29 = int_to_ptr.vmem [resolvable:$true] %s158_s29 }
  0x10   : > { %p438_p11 = scmp.ge.s32.totalorder %s703_s17, 2  ;;  %s893_s30 = smov 64  }
  0x11   : > { %p487_p9 = pneg %p787_p8  ;;  %s707_s4 = smov 4  }
  0x12   : > { %s32_s5 = sadd.s32 1, %s699_s16  ;;  %s39_s6 = sadd.s32 1, %s691_s14 }
  0x13   : > { %p488_p10 = pnand %p487_p9, %p764_p1  ;;  %p34_p12 = scmp.ge.s32.totalorder %s32_s5, 2 }
  0x14   : > { %s156_s26 = sshll.u32 %s899_s1, 4  ;;  %p46_p13 = scmp.ne.s32.totalorder %s691_s14, %s687_s13  ;;  %s157_s26 = int_to_ptr.hbm [resolvable:$true] %s156_s26 }
  0x15   : > { %490 = dma.hbm_to_vmem [thread:$0]  (!%p488_p10), %s157_s26, 512, %s159_s29, [#allocation6], %s893_s30, %s893_s30, %s707_s4  }
  0x16   : > { %p47_p0 = scmp.eq.s32.totalorder %s703_s17, 0  ;;  %s910_s5 = smov (%p34_p12, %s32_s5), 0 }
  0x17   : > { %p812_p5 = por %p768_p2, %p46_p13  ;;  %s36_s9 = ssub.s32 %s699_s16, %s910_s5 }
  0x18   : > { %p806_p3 = por %p47_p0, %p46_p13  ;;  %p500_p7 = scmp.lt.s32.totalorder %s703_s17, 2 }
  0x19   : > { %p37_p9 = scmp.eq.s32.totalorder %s36_s9, 0  ;;  %s178_s10 = sand.u32 1, %s691_s14  }
  0x1a   : > { %s439_s11 = sshll.u32 %s178_s10, 3  ;;  %s472_s19 = sshll.u32 %s699_s16, 3 }
  0x1b   : > { %s821_s18 = scalar_select %p37_p9, %s691_s14, %s39_s6  }
  0x1c   : > { %s187_s26 = scalar_lea.hbm %s889_s0, %s472_s19  ;;  %s182_s28 = scalar_lea.vmem [#allocation2], %s439_s11 }
  0x1d   : > { %s190_s29 = sshll.u32 %s182_s28, 4  ;;  %s188_s21 = sshll.u32 %s187_s26, 4  ;;  %s191_s29 = int_to_ptr.vmem [resolvable:$true] %s190_s29  ;;  %s189_s21 = int_to_ptr.hbm [resolvable:$true] %s188_s21 }
  0x1e   : > { %p492_p2 = pnand %p500_p7, %p806_p3  ;;  %s179_s30 = scalar_lea.sflag [#allocation3], %s178_s10 }
  0x1f   : > { %s903_s1 = smov 64   ;;  %202 = sbr.rel (%p787_p8) target bundleno = 195 (0xc3), region = 32 }
  0x20   : > { %494 = dma.hbm_to_vmem [thread:$0]  (!%p492_p2), %s189_s21, 128, %s191_s29, %s179_s30, %s903_s1, %s903_s1, %s707_s4  }
  0x21   : > { %s835_s6 = sand.u32 (!%p787_p8), 1, %s687_s13  }
  0x22   : > { %s443_s9 = sshll.u32 (!%p787_p8), %s835_s6, 3  ;;  %s205_s11 = scalar_lea.sflag (!%p787_p8), [#allocation3], %s835_s6 }
  0x23   : > { %s208_s19 = scalar_lea.vmem (!%p787_p8), [#allocation2], %s443_s9 }
  0x24   : > { %670 = dma.done.wait (%p774_p4), %s205_s11, 128  }
  0x25   : > { %672 = vsyncadd (%p774_p4), %s205_s11, 4294967168 }
  0x26   : > { %674 = dma.done.wait (%p764_p1), [#allocation6], 512  }
  0x27   : > { %676 = vsyncadd (%p764_p1), [#allocation6], 4294966784  ;;  %v477_v0 = vld [vmem:[#allocation5 + $0x18] sm:$0xff]  ;;  %v476_v1 = vld [vmem:[#allocation5 + $0x10] sm:$0xff]  ;;  %vm289_vm0 = vcmask 523264   ;;  %s445_s1 = sshll.u32 %s835_s6, 4 }
  0x28   : > { %297 = vmatpush.bf16.msra.mxu0 %v477_v0  ;;  %v475_v2 = vld [vmem:[#allocation5 + $0x8] sm:$0xff]  ;;  %v474_v3 = vld [vmem:[#allocation5] sm:$0xff]  ;;  %v473_v4 = vld [vmem:[%s208_s19] sm:$0xff]  ;;  %s478_s20 = sshll.u32 %s695_s15, 4  ;;  %s239_s10 = scalar_lea.vmem [#allocation7], %s445_s1 }
  0x29   : > { %v556_v5 = vld [vmem:[%s891_s2] ss:$0 sm:$0xff]  ;;  %s322_s7 = scalar_lea.hbm %s892_s3, %s478_s20  ;;  %s323_s24 = sshll.u32 %s239_s10, 4  ;;  %s324_s24 = int_to_ptr.vmem [resolvable:$true] %s323_s24 }
  0x2a   : > { %s325_s25 = sshll.u32 %s322_s7, 4  ;;  %s310_s26 = scalar_lea.sflag [#allocation4], %s835_s6  ;;  %s326_s25 = int_to_ptr.hbm [resolvable:$true] %s325_s25 }
  0x2b   : > { %s631_s28 = sshra.s32 %s326_s25, 4  ;;  %s637_s9 = scalar_lea.hbm %s892_s3, 32  ;;  %s632_s28 = int_to_ptr.hbm [resolvable:$true] %s631_s28 }
  0x2c   : > { %298 = vmatpush.bf16.msra.mxu0 %v476_v1  ;;  %s633_s15 = scalar_lea.hbm %s632_s28, 16  ;;  %p638_p10 = scmp.lt.s32.totalorder %s632_s28, %s892_s3 }
  0x2d   : > { %p634_p1 = scmp.ne.s32.totalorder %s632_s28, %s633_s15  ;;  %p639_p12 = scmp.lt.s32.totalorder %s637_s9, %s633_s15 }
  0x2f   : > { %p635_p4 = pnand %p634_p1, %p812_p5  ;;  %p640_p13 = por %p639_p12, %p638_p10 }
  0x30   : > { %299 = vmatpush.bf16.msra.mxu0 %v475_v2 }
  0x31   : > { %p636_p8 = pneg %p635_p4 }
  0x33   : > { %p641_p0 = pnand %p640_p13, %p636_p8 }
  0x34   : > { %300 = vmatpush.bf16.msra.mxu0 %v474_v3 }
  0x37   : > { %466 = vmatmul.msk.bf16.vlgmr.msra.gmra.mxu0 %vm289_vm0, %v473_v4 }
  0xb4   : > { %v302_v6 = vpop.f32.mrf.mxu0 }
  0xb5   : > { %v303_v7 = vadd.f32 %v556_v5, %v302_v6 }
  0xb7   : > { %307 = vst [vmem:[%s239_s10] sm:$0xff] %v303_v7 }
  0xbc   : > { %v304_v8 = vpop.f32.mrf.mxu0 }
  0xbd   : > { %v305_v9 = vadd.f32 %v556_v5, %v304_v8 }
  0xbf   : > { %308 = vst [vmem:[%s239_s10 + $0x8] sm:$0xff] %v305_v9 }
  0xc0   : > { %644 = shalt.err (!%p641_p0)
}
  0xc1   : > { %s708_s6 = smov 128   ;;  %s709_s1 = smov 8  }
  0xc2   : > { %485 = dma.vmem_to_hbm [thread:$0]  (%p812_p5), %s324_s24, 256, %s326_s25, %s310_s26, %s708_s6, %s708_s6, %s709_s1  }
  0xc3 PF: > { %s340_s22 = sand.u32 1, %s683_s12   ;;  %p496_p3 = pnand %p438_p11, %p779_p6 }
  0xc4   : > { %s341_s27 = scalar_lea.sflag [#allocation4], %s340_s22 }
  0xc5   : > { %p497_p7 = pneg %p496_p3 }
  0xc7   : > { %678 = dma.done.wait (%p497_p7), %s341_s27, 256  }
  0xc8   : > { %680 = vsyncadd (%p497_p7), %s341_s27, 4294967040  ;;  %s20_s17 = sadd.s32 1, %s703_s17   ;;  %s904_s12 = smov %s687_s13 }
  0xc9   : > { %p17_p9 = scmp.ge.s32.totalorder %s20_s17, 4   ;;  %s905_s13 = smov %s691_s14 }
  0xca   : > { %s906_s14 = smov %s821_s18  ;;  %s907_s15 = smov %s699_s16 }
  0xcb   : > { %s908_s16 = smov %s910_s5  ;;  %19 = sbr.rel (!%p17_p9) target bundleno = 9 (0x9), region = 85 }
  0xd0   :  { %347 = vsyncpa [#allocation3], 1 }
  0xd1   :  { %349 = vsyncpa [#allocation3 + $0x1], 1 }
  0xd2   :  { %350 = vsyncpa [#allocation6], 1 }
  0xd3   :  { %351 = vsyncpa [#allocation4], 1 }
  0xd4   :  { %353 = vsyncpa [#allocation4 + $0x1], 1 }

</bundles_post_ra>
